<compile_context>
chip_gen: v7x
topology: tpu7x:2x2x1
jax: 0.10.0
libtpu: 0.0.40
codegen_flags: <defaults>
</compile_context>

<pallas_src>
import numpy as np
import jax
import jax.numpy as jnp
from jax.experimental import pallas as pl
from jax.experimental.pallas import tpu as pltpu

HIDDEN = 32


def _policy_kernel(xT_ref, w1_ref, b1_ref, w2_ref, b2_ref, w3_ref, b3_ref, out_ref):
    # Per batch tile of width bm (all f32):
    #   xT_ref : (n_states, bm)          w1: (32, n_states)   b1: (32, 1)
    #   w2     : (32, 32)  b2: (32, 1)   w3: (n_actions, 32)  b3: (n_actions, 1)
    #   out_ref: (2, n_actions, bm)  ->  [0] = probs, [1] = log_probs
    xT = xT_ref[...]

    h1 = jnp.dot(w1_ref[...], xT, preferred_element_type=jnp.float32) + b1_ref[...]
    h1 = jnp.maximum(h1, 0.0)

    h2 = jnp.dot(w2_ref[...], h1, preferred_element_type=jnp.float32) + b2_ref[...]
    h2 = jnp.maximum(h2, 0.0)

    logits = jnp.dot(w3_ref[...], h2, preferred_element_type=jnp.float32) + b3_ref[...]

    # Numerically stable log-softmax over the (tiny) action axis (= sublanes).
    m = jnp.max(logits, axis=0, keepdims=True)
    z = logits - m
    s = jnp.sum(jnp.exp(z), axis=0, keepdims=True)
    logp = z - jnp.log(s)
    probs = jnp.exp(logp)          # exp on EUP; exactly consistent with logp

    out_ref[0] = probs
    out_ref[1] = logp


def _round_up(x, m):
    return ((x + m - 1) // m) * m


@jax.jit
def _forward_impl(states, params):
    B, n_states = states.shape
    n_actions = params["w3"].shape[0]

    # Lane-dense batch tile (multiple of 128), capped so VMEM stays tiny even on
    # v7x's 64 MiB physical / 32 MiB scoped budget.
    bm = 512 if B >= 512 else _round_up(max(B, 1), 128)
    B_pad = _round_up(B, bm)

    # (B, n_states) -> (n_states, B_pad): batch on the 128-lane axis.
    xT = jnp.pad(states, ((0, B_pad - B), (0, 0))).T

    pinned = lambda i: (0, 0)

    out = pl.pallas_call(
        _policy_kernel,
        out_shape=jax.ShapeDtypeStruct((2, n_actions, B_pad), jnp.float32),
        grid=(B_pad // bm,),
        in_specs=[
            pl.BlockSpec((n_states, bm), lambda i: (0, i)),
            pl.BlockSpec((HIDDEN, n_states), pinned),
            pl.BlockSpec((HIDDEN, 1), pinned),
            pl.BlockSpec((HIDDEN, HIDDEN), pinned),
            pl.BlockSpec((HIDDEN, 1), pinned),
            pl.BlockSpec((n_actions, HIDDEN), pinned),
            pl.BlockSpec((n_actions, 1), pinned),
        ],
        out_specs=pl.BlockSpec((2, n_actions, bm), lambda i: (0, 0, i)),
        compiler_params=pltpu.CompilerParams(
            dimension_semantics=("parallel",)),
    )(xT, params["w1"], params["b1"], params["w2"], params["b2"],
      params["w3"], params["b3"])

    probs = out[0, :, :B].T          # (B, n_actions)
    log_probs = out[1, :, :B].T      # (B, n_actions)
    no_grad_probs = jax.lax.stop_gradient(probs)
    return no_grad_probs, probs, log_probs


def mlp_policy_forward(states, params):
    """Forward of the PGCartPole policy: (no_grad_probs, probs, log_probs).

    Matches torch's (softmax(x).detach(), softmax(x), log_softmax(x)).
    no_grad_probs is returned as a *device* array (stop_gradient'ed); convert
    with np.asarray() at the call site if numpy is needed — doing it here would
    force a blocking device->host sync on every policy step.
    """
    states = jnp.asarray(states, dtype=jnp.float32)
    return _forward_impl(states, params)


def init_params(key, n_states, n_actions, hidden=HIDDEN):
    """nn.Linear-style init, stored in torch layout: W (out, in), b (out, 1)."""
    ks = jax.random.split(key, 6)

    def lin(kw, kb, fan_in, fan_out):
        bound = 1.0 / np.sqrt(fan_in)
        w = jax.random.uniform(kw, (fan_out, fan_in), jnp.float32, -bound, bound)
        b = jax.random.uniform(kb, (fan_out, 1), jnp.float32, -bound, bound)
        return w, b

    w1, b1 = lin(ks[0], ks[1], n_states, hidden)
    w2, b2 = lin(ks[2], ks[3], hidden, hidden)
    w3, b3 = lin(ks[4], ks[5], hidden, n_actions)
    return dict(w1=w1, b1=b1, w2=w2, b2=b2, w3=w3, b3=b3)


if __name__ == "__main__":
    key = jax.random.PRNGKey(0)
    n_states, n_actions, batch = 4, 2, 8  # CartPole-like dims

    k_param, k_x = jax.random.split(key)
    params = init_params(k_param, n_states, n_actions)
    states = jax.random.normal(k_x, (batch, n_states), dtype=jnp.float32)

    no_grad_probs, probs, log_probs = mlp_policy_forward(states, params)
    jax.block_until_ready((no_grad_probs, probs, log_probs))

    # Pure-JAX reference (caller-side numpy conversion only here, for checks).
    def ref(x, p):
        h1 = jnp.maximum(x @ p["w1"].T + p["b1"].T, 0.0)
        h2 = jnp.maximum(h1 @ p["w2"].T + p["b2"].T, 0.0)
        logits = h2 @ p["w3"].T + p["b3"].T
        return jax.nn.softmax(logits, -1), jax.nn.log_softmax(logits, -1)

    ref_p, ref_lp = ref(states, params)
    assert np.allclose(np.asarray(probs), np.asarray(ref_p), atol=1e-5)
    assert np.allclose(np.asarray(log_probs), np.asarray(ref_lp), atol=1e-5)
    assert np.allclose(np.asarray(probs).sum(-1), 1.0, atol=1e-5)
    assert np.allclose(np.exp(np.asarray(log_probs)), np.asarray(probs), atol=1e-6)
    assert np.allclose(np.asarray(no_grad_probs), np.asarray(probs), atol=0.0)

    print("KERNEL_OK")
</pallas_src>

<mosaic_0001>
module attributes {stable_mosaic.version = 11 : i64} {
  func.func @_policy_kernel(%arg0: i32, %arg1: memref<4x128xf32, #tpu.memory_space<vmem>>, %arg2: memref<32x4xf32, #tpu.memory_space<vmem>>, %arg3: memref<32x1xf32, #tpu.memory_space<vmem>>, %arg4: memref<32x32xf32, #tpu.memory_space<vmem>>, %arg5: memref<32x1xf32, #tpu.memory_space<vmem>>, %arg6: memref<2x32xf32, #tpu.memory_space<vmem>>, %arg7: memref<2x1xf32, #tpu.memory_space<vmem>>, %arg8: memref<2x2x128xf32, #tpu.memory_space<vmem>>) attributes {dimension_semantics = [#tpu.dimension_semantics<parallel>], iteration_bounds = array<i64: 1>, scalar_prefetch = 0 : i64, scratch_operands = 0 : i64, tpu.core_type = #tpu.core_type<tc>, window_params = [{transform_indices = @transform_0, window_bounds = array<i64: 4, 128>}, {pipeline_mode = #tpu.pipeline_mode<synchronous>, transform_indices = @transform_1, window_bounds = array<i64: 32, 4>}, {pipeline_mode = #tpu.pipeline_mode<synchronous>, transform_indices = @transform_2, window_bounds = array<i64: 32, 1>}, {pipeline_mode = #tpu.pipeline_mode<synchronous>, transform_indices = @transform_3, window_bounds = array<i64: 32, 32>}, {pipeline_mode = #tpu.pipeline_mode<synchronous>, transform_indices = @transform_4, window_bounds = array<i64: 32, 1>}, {pipeline_mode = #tpu.pipeline_mode<synchronous>, transform_indices = @transform_5, window_bounds = array<i64: 2, 32>}, {pipeline_mode = #tpu.pipeline_mode<synchronous>, transform_indices = @transform_6, window_bounds = array<i64: 2, 1>}, {transform_indices = @transform_7, window_bounds = array<i64: 2, 2, 128>}]} {
    %c0 = arith.constant 0 : index
    %c0_0 = arith.constant 0 : index
    %0 = vector.load %arg1[%c0, %c0_0] : memref<4x128xf32, #tpu.memory_space<vmem>>, vector<4x128xf32>
    %c0_1 = arith.constant 0 : index
    %c0_2 = arith.constant 0 : index
    %1 = vector.load %arg2[%c0_1, %c0_2] : memref<32x4xf32, #tpu.memory_space<vmem>>, vector<32x4xf32>
    %cst = arith.constant dense<0.000000e+00> : vector<32x128xf32>
    %2 = tpu.matmul %1, %0, %cst {dimension_numbers = #tpu.dot_dimension_numbers<[1], [0], [0], [1], [0, 0, 1, 1], [], []>} : vector<32x4xf32>, vector<4x128xf32>, vector<32x128xf32> -> vector<32x128xf32>
    %c0_3 = arith.constant 0 : index
    %c0_4 = arith.constant 0 : index
    %3 = vector.load %arg3[%c0_3, %c0_4] : memref<32x1xf32, #tpu.memory_space<vmem>>, vector<32x1xf32>
    %4 = vector.broadcast %3 : vector<32x1xf32> to vector<32x128xf32>
    %5 = arith.addf %2, %4 : vector<32x128xf32>
    %cst_5 = arith.constant 0.000000e+00 : f32
    %6 = vector.broadcast %cst_5 : f32 to vector<32x128xf32>
    %7 = arith.maximumf %5, %6 : vector<32x128xf32>
    %c0_6 = arith.constant 0 : index
    %c0_7 = arith.constant 0 : index
    %8 = vector.load %arg4[%c0_6, %c0_7] : memref<32x32xf32, #tpu.memory_space<vmem>>, vector<32x32xf32>
    %cst_8 = arith.constant dense<0.000000e+00> : vector<32x128xf32>
    %9 = tpu.matmul %8, %7, %cst_8 {dimension_numbers = #tpu.dot_dimension_numbers<[1], [0], [0], [1], [0, 0, 1, 1], [], []>} : vector<32x32xf32>, vector<32x128xf32>, vector<32x128xf32> -> vector<32x128xf32>
    %c0_9 = arith.constant 0 : index
    %c0_10 = arith.constant 0 : index
    %10 = vector.load %arg5[%c0_9, %c0_10] : memref<32x1xf32, #tpu.memory_space<vmem>>, vector<32x1xf32>
    %11 = vector.broadcast %10 : vector<32x1xf32> to vector<32x128xf32>
    %12 = arith.addf %9, %11 : vector<32x128xf32>
    %cst_11 = arith.constant 0.000000e+00 : f32
    %13 = vector.broadcast %cst_11 : f32 to vector<32x128xf32>
    %14 = arith.maximumf %12, %13 : vector<32x128xf32>
    %c0_12 = arith.constant 0 : index
    %c0_13 = arith.constant 0 : index
    %15 = vector.load %arg6[%c0_12, %c0_13] : memref<2x32xf32, #tpu.memory_space<vmem>>, vector<2x32xf32>
    %cst_14 = arith.constant dense<0.000000e+00> : vector<2x128xf32>
    %16 = tpu.matmul %15, %14, %cst_14 {dimension_numbers = #tpu.dot_dimension_numbers<[1], [0], [0], [1], [0, 0, 1, 1], [], []>} : vector<2x32xf32>, vector<32x128xf32>, vector<2x128xf32> -> vector<2x128xf32>
    %c0_15 = arith.constant 0 : index
    %c0_16 = arith.constant 0 : index
    %17 = vector.load %arg7[%c0_15, %c0_16] : memref<2x1xf32, #tpu.memory_space<vmem>>, vector<2x1xf32>
    %18 = vector.broadcast %17 : vector<2x1xf32> to vector<2x128xf32>
    %19 = arith.addf %16, %18 : vector<2x128xf32>
    %cst_17 = arith.constant dense<0xFF800000> : vector<128xf32>
    %20 = vector.multi_reduction <maximumf>, %19, %cst_17 [0] : vector<2x128xf32> to vector<128xf32>
    %21 = vector.shape_cast %20 : vector<128xf32> to vector<1x128xf32>
    %22 = vector.broadcast %21 : vector<1x128xf32> to vector<2x128xf32>
    %23 = arith.subf %19, %22 : vector<2x128xf32>
    %24 = math.exp %23 : vector<2x128xf32>
    %cst_18 = arith.constant dense<0.000000e+00> : vector<128xf32>
    %25 = vector.multi_reduction <add>, %24, %cst_18 [0] : vector<2x128xf32> to vector<128xf32>
    %26 = vector.shape_cast %25 : vector<128xf32> to vector<1x128xf32>
    %27 = math.log %26 : vector<1x128xf32>
    %28 = vector.broadcast %27 : vector<1x128xf32> to vector<2x128xf32>
    %29 = arith.subf %23, %28 : vector<2x128xf32>
    %30 = math.exp %29 : vector<2x128xf32>
    %c0_19 = arith.constant 0 : index
    %c0_20 = arith.constant 0 : index
    %c0_21 = arith.constant 0 : index
    %31 = vector.load %arg8[%c0_19, %c0_20, %c0_21] : memref<2x2x128xf32, #tpu.memory_space<vmem>>, vector<1x2x128xf32>
    %32 = vector.shape_cast %31 : vector<1x2x128xf32> to vector<2x128xf32>
    %33 = vector.shape_cast %30 : vector<2x128xf32> to vector<1x2x128xf32>
    tpu.vector_store %arg8[%c0_19, %c0_20, %c0_21], %33 {strides = array<i32>} : memref<2x2x128xf32, #tpu.memory_space<vmem>>, vector<1x2x128xf32>,
    %c1 = arith.constant 1 : index
    %c0_22 = arith.constant 0 : index
    %c0_23 = arith.constant 0 : index
    %34 = vector.load %arg8[%c1, %c0_22, %c0_23] : memref<2x2x128xf32, #tpu.memory_space<vmem>>, vector<1x2x128xf32>
    %35 = vector.shape_cast %34 : vector<1x2x128xf32> to vector<2x128xf32>
    %36 = vector.shape_cast %29 : vector<2x128xf32> to vector<1x2x128xf32>
    tpu.vector_store %arg8[%c1, %c0_22, %c0_23], %36 {strides = array<i32>} : memref<2x2x128xf32, #tpu.memory_space<vmem>>, vector<1x2x128xf32>,
    return
  }
  func.func @transform_0(%arg0: i32) -> (i32, i32) {
    %c0_i32 = arith.constant 0 : i32
    %c0_i32_0 = arith.constant 0 : i32
    return %c0_i32, %arg0 : i32, i32
  }
  func.func @transform_1(%arg0: i32) -> (i32, i32) {
    %c0_i32 = arith.constant 0 : i32
    %c0_i32_0 = arith.constant 0 : i32
    %c0_i32_1 = arith.constant 0 : i32
    return %c0_i32, %c0_i32_0 : i32, i32
  }
  func.func @transform_2(%arg0: i32) -> (i32, i32) {
    %c0_i32 = arith.constant 0 : i32
    %c0_i32_0 = arith.constant 0 : i32
    %c0_i32_1 = arith.constant 0 : i32
    return %c0_i32, %c0_i32_0 : i32, i32
  }
  func.func @transform_3(%arg0: i32) -> (i32, i32) {
    %c0_i32 = arith.constant 0 : i32
    %c0_i32_0 = arith.constant 0 : i32
    %c0_i32_1 = arith.constant 0 : i32
    return %c0_i32, %c0_i32_0 : i32, i32
  }
  func.func @transform_4(%arg0: i32) -> (i32, i32) {
    %c0_i32 = arith.constant 0 : i32
    %c0_i32_0 = arith.constant 0 : i32
    %c0_i32_1 = arith.constant 0 : i32
    return %c0_i32, %c0_i32_0 : i32, i32
  }
  func.func @transform_5(%arg0: i32) -> (i32, i32) {
    %c0_i32 = arith.constant 0 : i32
    %c0_i32_0 = arith.constant 0 : i32
    %c0_i32_1 = arith.constant 0 : i32
    return %c0_i32, %c0_i32_0 : i32, i32
  }
  func.func @transform_6(%arg0: i32) -> (i32, i32) {
    %c0_i32 = arith.constant 0 : i32
    %c0_i32_0 = arith.constant 0 : i32
    %c0_i32_1 = arith.constant 0 : i32
    return %c0_i32, %c0_i32_0 : i32, i32
  }
  func.func @transform_7(%arg0: i32) -> (i32, i32, i32) {
    %c0_i32 = arith.constant 0 : i32
    %c0_i32_0 = arith.constant 0 : i32
    %c0_i32_1 = arith.constant 0 : i32
    return %c0_i32, %c0_i32_0, %arg0 : i32, i32, i32
  }
}

</mosaic_0001>

<bundles_post_ra>
// kernel: _forward_impl.1
= control target key start
LH: loop header
LB: loop body
LE: loop exit
PB: predicated region body
PF: predicated region fallthrough
CT: control target
= control target key end

     0   :  { %vm68_vm0 = vcmask 1043456   ;;  %vm55_vm1 = vcmask 31744   ;;  %v489_v3 = vmov 0   ;;  %vm189_vm2 = vcmask 261120   ;;  %s605_s0 = inlined_call_operand.vmem [shape: f32[4,128], index: 0, kind: input, shape index: {}]   ;;  %s606_s1 = inlined_call_operand.vmem [shape: f32[32,4], index: 1, kind: input, shape index: {}]   ;;  %s607_s2 = inlined_call_operand.vmem [shape: f32[32,1], index: 2, kind: input, shape index: {}]   ;;  %s608_s4 = inlined_call_operand.vmem [shape: f32[32,1], index: 4, kind: input, shape index: {}]   ;;  %s609_s6 = inlined_call_operand.vmem [shape: f32[2,1], index: 6, kind: input, shape index: {}]   ;;  %s610_s3 = inlined_call_operand.vmem [shape: f32[32,32], index: 3, kind: input, shape index: {}]   ;;  %s611_s5 = inlined_call_operand.vmem [shape: f32[2,32], index: 5, kind: input, shape index: {}]   ;;  %s612_s7 = inlined_call_operand.vmem [shape: f32[2,2,128], index: 7, kind: output, shape index: {}]  }
   0x1   :  { %v26_v0 = vld [vmem:[%s605_s0] sm:$0xf]  ;;  %v28_v2 = vld [vmem:[%s606_s1 + $0x8] sm:$0xff]  ;;  %481 = vset.pattern.permute.xlu0 %v489_v3  ;;  %482 = vset.pattern.permute.xlu1 %v489_v3  ;;  %v29_v4 = vld [vmem:[%s606_s1 + $0x10] sm:$0xff]  ;;  %v490_v37 = vmov 0.0|0.0   ;;  %vm491_vm3 = vmmov 0  }
   0x2   :  { %v27_v1 = vld [vmem:[%s606_s1] sm:$0xff]  ;;  %430 = vmatprep.subr.msk.mxu0 %vm68_vm0, %v26_v0  ;;  %v33_v6 = vld [vmem:[%s607_s2 + $0x10] sm:$0xff]  ;;  %v32_v7 = vld [vmem:[%s607_s2 + $0x8] sm:$0xff]  ;;  %v492_v38 = vmov 0.0   ;;  %vm371_vm4 = vcmask 1041408  }
   0x3   :  { %432 = vmatprep.mubr.msk.f32.mxu0 %vm55_vm1, %v27_v1  ;;  %v31_v5 = vld [vmem:[%s607_s2] sm:$0xff]  ;;  %431 = vmatpush3.msk.msra.mxu0 %vm68_vm0, %v26_v0  ;;  %v30_v8 = vld [vmem:[%s606_s1 + $0x18] sm:$0xff]  ;;  %v166_v11 = vld [vmem:[%s608_s4 + $0x8] sm:$0xff] }
   0x4   :  { %37 = vperm.xlu0 %481, %v31_v5   ;;  %433 = vmatmul.mubr.msk.f32.vlgmr.msra.gmra.mrb[0].mxu0 %vm55_vm1, %v28_v2  ;;  %v34_v9 = vld [vmem:[%s607_s2 + $0x18] sm:$0xff]  ;;  %v165_v10 = vld [vmem:[%s608_s4] sm:$0xff]  ;;  %v167_v12 = vld [vmem:[%s608_s4 + $0x10] sm:$0xff] }
   0x5   :  { %47 = vperm.xlu1 %482, %v33_v6   ;;  %435 = vmatprep.mubr.msk.f32.mxu0 %vm55_vm1, %v29_v4  ;;  %v168_v13 = vld [vmem:[%s608_s4 + $0x18] sm:$0xff]  ;;  %v292_v14 = vld [vmem:[%s609_s6] sm:$0x3]  ;;  %v162_v34 = vld [vmem:[%s610_s3 + $0x8] sm:$0xff] }
   0x6   :  { %v161_v15 = vld [vmem:[%s610_s3] sm:$0xff]  ;;  %v163_v35 = vld [vmem:[%s610_s3 + $0x10] sm:$0xff]  ;;  %v164_v36 = vld [vmem:[%s610_s3 + $0x18] sm:$0xff]  ;;  %471 = vmatprep.subr.bf16.mxu0 %v490_v37 }
   0x7   :  { %446 = vmatprep.mubr.msk.f32.mxu1 %vm189_vm2, %v161_v15  ;;  %v291_v57 = vld [vmem:[%s611_s5] sm:$0x3] }
   0x8   :  { %42 = vperm.xlu0 %481, %v32_v7   ;;  %436 = vmatmul.mubr.msk.f32.gmra.mrb[2].mxu0 %vm55_vm1, %v30_v8 }
   0x9   :  { %52 = vperm.xlu1 %482, %v34_v9   ;;  %460 = vmatprep.mubr.msk.f32.mxu0 %vm491_vm3, %v492_v38 }
   0xc   :  { %171 = vperm.xlu0 %481, %v165_v10  }
   0xd   :  { %176 = vperm.xlu1 %482, %v166_v11  }
  0x10   :  { %181 = vperm.xlu0 %481, %v167_v12  }
  0x11   :  { %186 = vperm.xlu1 %482, %v168_v13  }
  0x14   :  { %295 = vperm.xlu0 %481, %v292_v14  }
  0x83   :  { %v38_v16 = vpop.permute.xlu0 %37 }
  0x84   :  { %v48_v17 = vpop.permute.xlu1 %47 }
  0x87   :  { %v43_v18 = vpop.permute.xlu0 %42 }
  0x88   :  { %v53_v24 = vpop.permute.xlu1 %52 }
  0x8b   :  { %v172_v40 = vpop.permute.xlu0 %171 }
  0x8c   :  { %v177_v39 = vpop.permute.xlu1 %176 }
  0x8f   :  { %v182_v49 = vpop.permute.xlu0 %181 }
  0x90   :  { %v187_v46 = vpop.permute.xlu1 %186 }
  0x93   :  { %v296_v58 = vpop.permute.xlu0 %295 }
  0xd7   :  { %v434_v19 = vpop.f32.mrb[0].mxu0 }
  0xd8   :  { %v144_v20 = vadd.f32 %v434_v19, %v43_v18  ;;  %v138_v21 = vpop.f32.mrb[1].mxu0 }
  0xd9   :  { %v139_v22 = vadd.f32 %v138_v21, %v38_v16 }
  0xda   :  { %v158_v23 = vmax.f32 %v144_v20, 0.0 }
  0xdb   :  { %v157_v25 = vmax.f32 %v139_v22, 0.0  ;;  %v437_v26 = vpop.f32.mrb[2].mxu0 }
  0xdc   :  { %v154_v27 = vadd.f32 %v437_v26, %v53_v24  ;;  %v148_v28 = vpop.f32.mrb[3].mxu0 }
  0xdd   :  { %v149_v29 = vadd.f32 %v148_v28, %v48_v17  ;;  %v463_v30 = vpack.c.bf16 %v158_v23, %v157_v25 }
  0xde   :  { %v160_v31 = vmax.f32 %v154_v27, 0.0 }
  0xdf   :  { %v159_v32 = vmax.f32 %v149_v29, 0.0  ;;  %464 = vmatprep.subr.bf16.mxu1 %v463_v30 }
  0xe0   :  { %466 = vmatpush3.bf16.msra.mxu1 %v463_v30 }
  0xe1   :  { %v467_v33 = vpack.c.bf16 %v160_v31, %v159_v32 }
  0xe3   :  { %468 = vmatprep.subr.bf16.mxu1 %v467_v33 }
  0xe4   :  { %470 = vmatpush3.bf16.msra.mxu1 %v467_v33 }
  0xe7   :  { %447 = vmatmul.mubr.msk.f32.vlgmr.msra.gmra.mrb[0].mxu1 %vm189_vm2, %v162_v34 }
  0xe8   :  { %449 = vmatprep.mubr.msk.f32.mxu1 %vm189_vm2, %v163_v35 }
  0xeb   :  { %450 = vmatmul.mubr.msk.f32.gmra.mrb[2].mxu1 %vm189_vm2, %v164_v36 }
 0x1ba   :  { %v448_v41 = vpop.f32.mrb[0].mxu1 }
 0x1bb   :  { %v274_v42 = vadd.f32 %v448_v41, %v177_v39  ;;  %v268_v43 = vpop.f32.mrb[1].mxu1 }
 0x1bc   :  { %v269_v44 = vadd.f32 %v268_v43, %v172_v40 }
 0x1bd   :  { %v288_v45 = vmax.f32 %v274_v42, 0.0 }
 0x1be   :  { %v287_v47 = vmax.f32 %v269_v44, 0.0  ;;  %v451_v48 = vpop.f32.mrb[2].mxu1 }
 0x1bf   :  { %v284_v50 = vadd.f32 %v451_v48, %v187_v46  ;;  %v278_v51 = vpop.f32.mrb[3].mxu1 }
 0x1c0   :  { %v472_v52 = vpack.c.bf16 %v288_v45, %v287_v47  ;;  %v279_v53 = vadd.f32 %v278_v51, %v182_v49 }
 0x1c1   :  { %v290_v54 = vmax.f32 %v284_v50, 0.0 }
 0x1c2   :  { %v289_v55 = vmax.f32 %v279_v53, 0.0  ;;  %473 = vmatpush3.bf16.msra.mxu0 %v472_v52 }
 0x1c3   :  { %474 = vmatprep.subr.bf16.mxu0 %v490_v37 }
 0x1c4   :  { %v475_v56 = vpack.c.bf16 %v290_v54, %v289_v55 }
 0x1c6   :  { %476 = vmatpush3.bf16.msra.mxu0 %v475_v56 }
 0x1c9   :  { %461 = vmatmul.mubr.msk.f32.vlgmr.msra.gmra.mrb[4].mxu0 %vm189_vm2, %v291_v57 }
 0x29c   :  { %v367_v59 = vpop.f32.mrb[4].mxu0 }
 0x29d   :  { %v368_v60 = vadd.f32 %v367_v59, %v296_v58  ;;  %v462_v61 = vpop.f32.mrb[5].mxu0 }
 0x29f   :  { %v372_v62 = vsel %vm371_vm4, %v368_v60, -inf }
 0x2a0   :  { %v373_v63 = vrot.slane %v372_v62, 4 }
 0x2a2   :  { %v374_v0 = vmax.f32 %v372_v62, %v373_v63 }
 0x2a4   :  { %v375_v1 = vrot.slane %v374_v0, 2 }
 0x2a6   :  { %v376_v2 = vmax.f32 %v374_v0, %v375_v1 }
 0x2a8   :  { %v377_v3 = vrot.slane %v376_v2, 1 }
 0x2aa   :  { %v378_v4 = vmax.f32 %v376_v2, %v377_v3 }
 0x2ac   :  { %v379_v5 = vsub.f32 %v368_v60, %v378_v4 }
 0x2ae   :  { %v380_v6 = vmul.f32 1.442695, %v379_v5 }
 0x2b0   :  { %483 = vpow2.f32 %v380_v6 }
 0x2ba   :  { %v484_v7 = vpop.eup %483 }
 0x2bb   :  { %v382_v8 = vsel %vm371_vm4, %v484_v7, 0.0 }
 0x2bc   :  { %v383_v9 = vrot.slane %v382_v8, 4 }
 0x2be   :  { %v384_v10 = vadd.f32 %v383_v9, %v382_v8 }
 0x2c0   :  { %v385_v11 = vrot.slane %v384_v10, 2 }
 0x2c2   :  { %v386_v12 = vadd.f32 %v385_v11, %v384_v10 }
 0x2c4   :  { %v387_v13 = vrot.slane %v386_v12, 1 }
 0x2c6   :  { %v388_v14 = vadd.f32 %v387_v13, %v386_v12 }
 0x2c8   :  { %485 = vlog2.f32 %v388_v14 }
 0x2d2   :  { %v486_v15 = vpop.eup %485 }
 0x2d3   :  { %v390_v16 = vmul.f32 0.6931472, %v486_v15 }
 0x2d5   :  { %v391_v17 = vsub.f32 %v379_v5, %v390_v16 }
 0x2d7   :  { %v392_v18 = vmul.f32 1.442695, %v391_v17  ;;  %411 = vst [vmem:[%s612_s7 + $0x2] sm:$0x3] %v391_v17 }
 0x2d9   :  { %487 = vpow2.f32 %v392_v18 }
 0x2e3   :  { %v488_v19 = vpop.eup %487 }
 0x2e4   :  { %394 = vst [vmem:[%s612_s7] sm:$0x3] %v488_v19 }

</bundles_post_ra>
